<compile_context>
chip_gen: v7x
topology: tpu7x:2x2x1
jax: 0.10.0
libtpu: 0.0.40
codegen_flags: <defaults>
</compile_context>

<pallas_src>
import math
import functools

import jax
import jax.numpy as jnp
from jax.experimental import pallas as pl
from jax.experimental.pallas import tpu as pltpu


# ----------------------------------------------------------------------------
# Hardware-aware configuration
# ----------------------------------------------------------------------------
def _vmem_limit_bytes():
    """Scoped-VMEM budget: ~3/4 of physical VMEM, clamped to [32, 96] MiB.
    -> 96 MiB on v5e/v6e (128 MiB physical), 48 MiB on v7x (64 MiB physical)."""
    try:
        cap = pltpu.get_tpu_info().vmem_capacity_bytes
    except Exception:
        cap = 64 * 1024 * 1024
    return int(min(96 * 2**20, max(32 * 2**20, (cap * 3) // 4)))


_VMEM_LIMIT = _vmem_limit_bytes()

# MXU-aligned tile preferences.  Small demo dims use the full (tiny) dim; at
# real BERT sizes these stay 128/256-aligned and keep double-buffered working
# sets well under the per-generation VMEM budget above (incl. v7x's 64 MiB).
_TM, _TN, _TK = 512, 512, 512    # dense matmul tiles (M, N, K)
_TV = 1024                       # vocab tile for the fused classifier kernels
_TR = 512                        # row tile for the standalone LayerNorm
_TQ, _TKV = 256, 512             # q / kv sequence tiles for flash attention

_NEG_INF = -1e30                 # finite "-inf" (avoids inf-inf NaNs)


def _round_up(x, m):
    return (x + m - 1) // m * m


def _tile(dim, pref):
    """Tile size + padded dim. Small dims use the full dim (allowed by the
    (8,128)-or-full rule); large dims use the aligned preference."""
    if dim <= pref:
        return dim, dim
    return pref, _round_up(dim, pref)


def _pad2(a, rows, cols, value=0):
    r, c = a.shape
    if (r, c) == (rows, cols):
        return a
    return jnp.pad(a, ((0, rows - r), (0, cols - c)), constant_values=value)


# ----------------------------------------------------------------------------
# Kernels
# ----------------------------------------------------------------------------
def _dense_kernel(x_ref, w_ref, b_ref, o_ref, acc_ref, *, activation):
    """Tiled matmul with f32 accumulator; bias (+ exact GELU) fused epilogue."""
    @pl.when(pl.program_id(2) == 0)
    def _():
        acc_ref[...] = jnp.zeros_like(acc_ref)

    acc_ref[...] += jnp.dot(x_ref[...], w_ref[...],
                            preferred_element_type=jnp.float32)

    @pl.when(pl.program_id(2) == pl.num_programs(2) - 1)
    def _():
        h = acc_ref[...] + b_ref[...]
        if activation == "gelu":
            # exact GELU (BERT default): 0.5 * x * (1 + erf(x / sqrt(2)))
            h = 0.5 * h * (1.0 + jax.lax.erf(h * (1.0 / math.sqrt(2.0))))
        o_ref[...] = h.astype(o_ref.dtype)


def _dense_add_ln_kernel(x_ref, w_ref, b_ref, r_ref, g_ref, bt_ref,
                         o_ref, acc_ref):
    """Matmul (full-N output block) with bias + residual-add + LayerNorm fused
    into the epilogue — removes a standalone [M, H] round trip per call."""
    @pl.when(pl.program_id(1) == 0)
    def _():
        acc_ref[...] = jnp.zeros_like(acc_ref)

    acc_ref[...] += jnp.dot(x_ref[...], w_ref[...],
                            preferred_element_type=jnp.float32)

    @pl.when(pl.program_id(1) == pl.num_programs(1) - 1)
    def _():
        x = acc_ref[...] + b_ref[...] + r_ref[...].astype(jnp.float32)
        mu = jnp.mean(x, axis=-1, keepdims=True)
        var = jnp.mean((x - mu) ** 2, axis=-1, keepdims=True)
        y = (x - mu) * jax.lax.rsqrt(var + 1e-12) * g_ref[...] + bt_ref[...]
        o_ref[...] = y.astype(o_ref.dtype)


def _ln_kernel(x_ref, g_ref, b_ref, o_ref):
    x = x_ref[...].astype(jnp.float32)
    mu = jnp.mean(x, axis=-1, keepdims=True)
    var = jnp.mean((x - mu) ** 2, axis=-1, keepdims=True)
    y = (x - mu) * jax.lax.rsqrt(var + 1e-12) * g_ref[...] + b_ref[...]
    o_ref[...] = y.astype(o_ref.dtype)


def _flash_attn_kernel(q_ref, k_ref, v_ref, bias_ref, o_ref,
                       m_sc, l_sc, acc_sc, *,
                       scale, n_heads, d_head, q_off, k_off, v_off):
    """Flash-style attention over KV blocks (grid axis 2), all heads per block.

    Q/K/V arrive as column slices of the fused QKV projection output (no
    materialized transpose); per-head online-softmax stats live in banked VMEM
    scratch; the epilogue assembles one lane-dense [tq, H] store."""
    ki = pl.program_id(2)

    @pl.when(ki == 0)
    def _():
        m_sc[...] = jnp.full_like(m_sc, _NEG_INF)
        l_sc[...] = jnp.zeros_like(l_sc)
        acc_sc[...] = jnp.zeros_like(acc_sc)

    q_all = q_ref[0]                    # [tq,  Wq] bf16
    k_all = k_ref[0]                    # [tkv, Wk] bf16
    v_all = v_ref[0]                    # [tkv, Wv] bf16
    bias = bias_ref[0]                  # [1, tkv] f32 additive mask

    for h in range(n_heads):            # static unroll over heads
        q = q_all[:, q_off + h * d_head: q_off + (h + 1) * d_head]
        k = k_all[:, k_off + h * d_head: k_off + (h + 1) * d_head]
        v = v_all[:, v_off + h * d_head: v_off + (h + 1) * d_head]

        s = jax.lax.dot_general(q, k, (((1,), (1,)), ((), ())),
                                preferred_element_type=jnp.float32)
        s = s * scale + bias                             # [tq, tkv] f32

        m_prev = m_sc[h]
        m_new = jnp.maximum(m_prev, jnp.max(s, axis=-1, keepdims=True))
        alpha = jnp.exp(m_prev - m_new)
        p = jnp.exp(s - m_new)
        l_sc[h] = alpha * l_sc[h] + jnp.sum(p, axis=-1, keepdims=True)
        acc_sc[h] = alpha * acc_sc[h] + jnp.dot(
            p.astype(v.dtype), v, preferred_element_type=jnp.float32)
        m_sc[h] = m_new

    @pl.when(ki == pl.num_programs(2) - 1)
    def _():
        ctx = jnp.concatenate(
            [(acc_sc[h] * pl.reciprocal(l_sc[h], approx=True)).astype(o_ref.dtype)
             for h in range(n_heads)], axis=-1)           # [tq, H] lane-dense
        o_ref[0] = ctx


def _cls_lse_kernel(x_ref, w_ref, b_ref, lse_ref, m_sc, l_sc):
    """Classifier matmul fused with online log-sum-exp over vocab tiles."""
    j = pl.program_id(1)

    @pl.when(j == 0)
    def _():
        m_sc[...] = jnp.full_like(m_sc, _NEG_INF)
        l_sc[...] = jnp.zeros_like(l_sc)

    logits = jnp.dot(x_ref[...], w_ref[...],
                     preferred_element_type=jnp.float32) + b_ref[...]
    m_prev = m_sc[...]
    m_new = jnp.maximum(m_prev, jnp.max(logits, axis=-1, keepdims=True))
    l_sc[...] = l_sc[...] * jnp.exp(m_prev - m_new) + jnp.sum(
        jnp.exp(logits - m_new), axis=-1, keepdims=True)
    m_sc[...] = m_new

    @pl.when(j == pl.num_programs(1) - 1)
    def _():
        lse_ref[...] = m_sc[...] + jnp.log(l_sc[...])


def _cls_prob_kernel(x_ref, w_ref, b_ref, lse_ref, o_ref):
    """Second pass: probs = exp(logits - lse); logits recomputed on the MXU
    instead of being round-tripped through HBM.  Output dtype = o_ref.dtype
    (bf16 by default, halving the largest HBM write of the inference path)."""
    logits = jnp.dot(x_ref[...], w_ref[...],
                     preferred_element_type=jnp.float32) + b_ref[...]
    o_ref[...] = jnp.exp(logits - lse_ref[...]).astype(o_ref.dtype)


def _cls_xent_kernel(x_ref, w_ref, b_ref, lab_ref, loss_ref, cnt_ref,
                     m_sc, l_sc, p_sc):
    """Classifier matmul fused with CrossEntropy(ignore_index=-1):
    online LSE + label-logit gather over vocab tiles, no logits in HBM."""
    j = pl.program_id(1)
    tv = w_ref.shape[1]

    @pl.when(j == 0)
    def _():
        m_sc[...] = jnp.full_like(m_sc, _NEG_INF)
        l_sc[...] = jnp.zeros_like(l_sc)
        p_sc[...] = jnp.zeros_like(p_sc)

    logits = jnp.dot(x_ref[...], w_ref[...],
                     preferred_element_type=jnp.float32) + b_ref[...]
    labels = lab_ref[...]                               # [tm, 1] int32
    cols = jax.lax.broadcasted_iota(jnp.int32, logits.shape, 1) + j * tv
    p_sc[...] += jnp.sum(jnp.where(cols == labels, logits, 0.0),
                         axis=-1, keepdims=True)

    m_prev = m_sc[...]
    m_new = jnp.maximum(m_prev, jnp.max(logits, axis=-1, keepdims=True))
    l_sc[...] = l_sc[...] * jnp.exp(m_prev - m_new) + jnp.sum(
        jnp.exp(logits - m_new), axis=-1, keepdims=True)
    m_sc[...] = m_new

    @pl.when(j == pl.num_programs(1) - 1)
    def _():
        valid = (labels != -1).astype(jnp.float32)
        lse = m_sc[...] + jnp.log(l_sc[...])
        loss_ref[...] = (lse - p_sc[...]) * valid
        cnt_ref[...] = valid


# ----------------------------------------------------------------------------
# Pallas-call wrappers
# ----------------------------------------------------------------------------
def pallas_dense(x, w, b, activation=None, out_dtype=jnp.bfloat16):
    M, K = x.shape
    N = w.shape[1]
    tm, Mp = _tile(M, _TM)
    tk, Kp = _tile(K, _TK)
    tn, Np = _tile(N, _TN)

    xp = _pad2(x, Mp, Kp).astype(jnp.bfloat16)
    wp = _pad2(w, Kp, Np).astype(jnp.bfloat16)
    bp = _pad2(b.astype(jnp.float32).reshape(1, N), 1, Np)

    out = pl.pallas_call(
        functools.partial(_dense_kernel, activation=activation),
        out_shape=jax.ShapeDtypeStruct((Mp, Np), out_dtype),
        grid=(Mp // tm, Np // tn, Kp // tk),
        in_specs=[
            pl.BlockSpec((tm, tk), lambda i, j, k: (i, k)),
            pl.BlockSpec((tk, tn), lambda i, j, k: (k, j)),
            pl.BlockSpec((1, tn), lambda i, j, k: (0, j)),
        ],
        out_specs=pl.BlockSpec((tm, tn), lambda i, j, k: (i, j)),
        scratch_shapes=[pltpu.VMEM((tm, tn), jnp.float32)],
        compiler_params=pltpu.CompilerParams(
            dimension_semantics=("parallel", "parallel", "arbitrary"),
            vmem_limit_bytes=_VMEM_LIMIT),
    )(xp, wp, bp)
    if (Mp, Np) != (M, N):
        out = out[:M, :N]
    return out


def pallas_dense_add_ln(x, w, b, res, gamma, beta, out_dtype=jnp.bfloat16):
    """out = LayerNorm(res + x @ w + b) with the add+LN fused into the matmul
    epilogue (full-N output block; N = hidden fits the f32 accumulator)."""
    M, K = x.shape
    N = w.shape[1]
    tm, Mp = _tile(M, _TM)
    tk, Kp = _tile(K, _TK)

    xp = _pad2(x, Mp, Kp).astype(jnp.bfloat16)
    wp = _pad2(w, Kp, N).astype(jnp.bfloat16)
    rp = _pad2(res, Mp, N).astype(jnp.bfloat16)
    bp = b.astype(jnp.float32).reshape(1, N)
    gp = gamma.astype(jnp.float32).reshape(1, N)
    btp = beta.astype(jnp.float32).reshape(1, N)

    out = pl.pallas_call(
        _dense_add_ln_kernel,
        out_shape=jax.ShapeDtypeStruct((Mp, N), out_dtype),
        grid=(Mp // tm, Kp // tk),
        in_specs=[
            pl.BlockSpec((tm, tk), lambda i, k: (i, k)),
            pl.BlockSpec((tk, N), lambda i, k: (k, 0)),
            pl.BlockSpec((1, N), lambda i, k: (0, 0)),
            pl.BlockSpec((tm, N), lambda i, k: (i, 0)),
            pl.BlockSpec((1, N), lambda i, k: (0, 0)),
            pl.BlockSpec((1, N), lambda i, k: (0, 0)),
        ],
        out_specs=pl.BlockSpec((tm, N), lambda i, k: (i, 0)),
        scratch_shapes=[pltpu.VMEM((tm, N), jnp.float32)],
        compiler_params=pltpu.CompilerParams(
            dimension_semantics=("parallel", "arbitrary"),
            vmem_limit_bytes=_VMEM_LIMIT),
    )(xp, wp, bp, rp, gp, btp)
    return out[:M] if Mp != M else out


def pallas_layernorm(x, gamma, beta, out_dtype=jnp.bfloat16):
    M, H = x.shape
    tr, Mp = _tile(M, _TR)
    xp = _pad2(x, Mp, H)
    row_spec = pl.BlockSpec((tr, H), lambda i: (i, 0))
    par_spec = pl.BlockSpec((1, H), lambda i: (0, 0))
    out = pl.pallas_call(
        _ln_kernel,
        out_shape=jax.ShapeDtypeStruct((Mp, H), out_dtype),
        grid=(Mp // tr,),
        in_specs=[row_spec, par_spec, par_spec],
        out_specs=row_spec,
        compiler_params=pltpu.CompilerParams(
            dimension_semantics=("parallel",),
            vmem_limit_bytes=_VMEM_LIMIT),
    )(xp, gamma.astype(jnp.float32).reshape(1, H),
      beta.astype(jnp.float32).reshape(1, H))
    return out[:M] if Mp != M else out


def pallas_flash_attention(qkv, bias, n_heads):
    """Multi-head self-attention reading directly from the fused QKV output.

    qkv:  [B, S, 3H] bf16 (concatenated Q | K | V projections)
    bias: [B, 1, S]  f32 additive attention mask
    returns context in [B, S, H] layout (ready for the wo matmul, no transpose).
    """
    B, S, H3 = qkv.shape
    H = H3 // 3
    d_head = H // n_heads
    scale = 1.0 / math.sqrt(d_head)

    if S <= 512:
        tq = tkv = Sp = S                      # full-dim blocks
    else:
        tq, tkv = _TQ, _TKV
        Sp = _round_up(S, _TKV)                # _TKV is a multiple of _TQ
    if Sp != S:
        qkv = jnp.pad(qkv, ((0, 0), (0, Sp - S), (0, 0)))
        bias = jnp.pad(bias, ((0, 0), (0, 0), (0, Sp - S)),
                       constant_values=-1e9)

    if H % 128 == 0:
        # Lane-aligned hidden (real BERT): separate width-H column blocks for
        # the Q / K / V roles -> no read amplification, lane-dense DMAs.
        q_spec = pl.BlockSpec((1, tq, H), lambda b, qi, ki: (b, qi, 0))
        k_spec = pl.BlockSpec((1, tkv, H), lambda b, qi, ki: (b, ki, 1))
        v_spec = pl.BlockSpec((1, tkv, H), lambda b, qi, ki: (b, ki, 2))
        q_off = k_off = v_off = 0
    else:
        # Small / unaligned hidden (demo): full-3H blocks, slice roles in-kernel.
        q_spec = pl.BlockSpec((1, tq, H3), lambda b, qi, ki: (b, qi, 0))
        k_spec = pl.BlockSpec((1, tkv, H3), lambda b, qi, ki: (b, ki, 0))
        v_spec = pl.BlockSpec((1, tkv, H3), lambda b, qi, ki: (b, ki, 0))
        q_off, k_off, v_off = 0, H, 2 * H

    bias_spec = pl.BlockSpec((1, 1, tkv), lambda b, qi, ki: (b, 0, ki))
    out_spec = pl.BlockSpec((1, tq, H), lambda b, qi, ki: (b, qi, 0))

    out = pl.pallas_call(
        functools.partial(_flash_attn_kernel, scale=scale, n_heads=n_heads,
                          d_head=d_head, q_off=q_off, k_off=k_off, v_off=v_off),
        out_shape=jax.ShapeDtypeStruct((B, Sp, H), qkv.dtype),
        grid=(B, Sp // tq, Sp // tkv),
        in_specs=[q_spec, k_spec, v_spec, bias_spec],
        out_specs=out_spec,
        scratch_shapes=[
            pltpu.VMEM((n_heads, tq, 1), jnp.float32),
            pltpu.VMEM((n_heads, tq, 1), jnp.float32),
            pltpu.VMEM((n_heads, tq, d_head), jnp.float32),
        ],
        compiler_params=pltpu.CompilerParams(
            dimension_semantics=("parallel", "parallel", "arbitrary"),
            vmem_limit_bytes=_VMEM_LIMIT),
    )(qkv, qkv, qkv, bias)
    return out[:, :S, :] if Sp != S else out


def _cls_specs(tm, H, tv, n_v_blocks):
    x_spec = pl.BlockSpec((tm, H), lambda i, j: (i, 0))
    if n_v_blocks >= 3:
        # extra buffering hides the vocab-weight DMA behind the MXU work
        w_spec = pl.BlockSpec((H, tv), lambda i, j: (0, j),
                              pipeline_mode=pl.Buffered(3))
    else:
        w_spec = pl.BlockSpec((H, tv), lambda i, j: (0, j))
    b_spec = pl.BlockSpec((1, tv), lambda i, j: (0, j))
    row_spec = pl.BlockSpec((tm, 1), lambda i, j: (i, 0))
    return x_spec, w_spec, b_spec, row_spec


def pallas_classifier_softmax(x, w, b, probs_dtype=jnp.bfloat16):
    """softmax(x @ w + b), fused & vocab-tiled: logits never touch HBM."""
    M, H = x.shape
    V = w.shape[1]
    tm, Mp = _tile(M, _TM)
    tv, Vp = _tile(V, _TV)

    xp = _pad2(x, Mp, H).astype(jnp.bfloat16)
    wp = _pad2(w, H, Vp).astype(jnp.bfloat16)
    bp = _pad2(b.astype(jnp.float32).reshape(1, V), 1, Vp, value=_NEG_INF)

    x_spec, w_spec, b_spec, row_spec = _cls_specs(tm, H, tv, Vp // tv)
    grid = (Mp // tm, Vp // tv)

    lse = pl.pallas_call(
        _cls_lse_kernel,
        out_shape=jax.ShapeDtypeStruct((Mp, 1), jnp.float32),
        grid=grid,
        in_specs=[x_spec, w_spec, b_spec],
        out_specs=row_spec,
        scratch_shapes=[pltpu.VMEM((tm, 1), jnp.float32)] * 2,
        compiler_params=pltpu.CompilerParams(
            dimension_semantics=("parallel", "arbitrary"),
            vmem_limit_bytes=_VMEM_LIMIT),
    )(xp, wp, bp)

    probs = pl.pallas_call(
        _cls_prob_kernel,
        out_shape=jax.ShapeDtypeStruct((Mp, Vp), probs_dtype),
        grid=grid,
        in_specs=[x_spec, w_spec, b_spec, row_spec],
        out_specs=pl.BlockSpec((tm, tv), lambda i, j: (i, j)),
        compiler_params=pltpu.CompilerParams(
            dimension_semantics=("parallel", "parallel"),
            vmem_limit_bytes=_VMEM_LIMIT),
    )(xp, wp, bp, lse)
    return probs[:M, :V]


def pallas_classifier_xent(x, w, b, labels):
    """CrossEntropyLoss(ignore_index=-1) fused with the classifier matmul."""
    M, H = x.shape
    V = w.shape[1]
    tm, Mp = _tile(M, _TM)
    tv, Vp = _tile(V, _TV)

    xp = _pad2(x, Mp, H).astype(jnp.bfloat16)
    wp = _pad2(w, H, Vp).astype(jnp.bfloat16)
    bp = _pad2(b.astype(jnp.float32).reshape(1, V), 1, Vp, value=_NEG_INF)
    # TODO(synk): move labels to SMEM scalar-prefetch instead of a lane-padded
    # (M, 1) int32 VMEM block once a cheap scalar->vector broadcast is available.
    labp = _pad2(labels.astype(jnp.int32).reshape(M, 1), Mp, 1, value=-1)

    x_spec, w_spec, b_spec, row_spec = _cls_specs(tm, H, tv, Vp // tv)
    lab_spec = pl.BlockSpec((tm, 1), lambda i, j: (i, 0))

    loss_rows, cnt = pl.pallas_call(
        _cls_xent_kernel,
        out_shape=(jax.ShapeDtypeStruct((Mp, 1), jnp.float32),
                   jax.ShapeDtypeStruct((Mp, 1), jnp.float32)),
        grid=(Mp // tm, Vp // tv),
        in_specs=[x_spec, w_spec, b_spec, lab_spec],
        out_specs=(row_spec, row_spec),
        scratch_shapes=[pltpu.VMEM((tm, 1), jnp.float32)] * 3,
        compiler_params=pltpu.CompilerParams(
            dimension_semantics=("parallel", "arbitrary"),
            vmem_limit_bytes=_VMEM_LIMIT),
    )(xp, wp, bp, labp)
    return jnp.sum(loss_rows) / jnp.maximum(jnp.sum(cnt), 1.0)


# ----------------------------------------------------------------------------
# Synthetic BERT parameters (deterministic init; matmul weights in bf16)
# ----------------------------------------------------------------------------
def init_params(key, vocab, hidden, n_layers, n_heads, ff, max_pos):
    def nrm(k, shape, dtype=jnp.float32):
        return (0.02 * jax.random.normal(k, shape)).astype(dtype)

    keys = iter(jax.random.split(key, 4 + 4 * n_layers))
    p = {
        "tok_emb": nrm(next(keys), (vocab, hidden)),
        "pos_emb": nrm(next(keys), (max_pos, hidden)),
        "typ_emb": nrm(next(keys), (2, hidden)),
        "emb_ln_g": jnp.ones((hidden,), jnp.float32),
        "emb_ln_b": jnp.zeros((hidden,), jnp.float32),
        "cls_w": nrm(next(keys), (hidden, vocab), jnp.bfloat16),
        "cls_b": jnp.zeros((vocab,), jnp.float32),
        "layers": [],
    }
    for _ in range(n_layers):
        kq = next(keys); ko = next(keys); k1 = next(keys); k2 = next(keys)
        layer = {
            # fused Q/K/V projection: single [H, 3H] matmul per layer
            "w_qkv": nrm(kq, (hidden, 3 * hidden), jnp.bfloat16),
            "b_qkv": jnp.zeros((3 * hidden,), jnp.float32),
            "wo": nrm(ko, (hidden, hidden), jnp.bfloat16),
            "bo": jnp.zeros((hidden,), jnp.float32),
            "attn_ln_g": jnp.ones((hidden,), jnp.float32),
            "attn_ln_b": jnp.zeros((hidden,), jnp.float32),
            "w1": nrm(k1, (hidden, ff), jnp.bfloat16),
            "b1": jnp.zeros((ff,), jnp.float32),
            "w2": nrm(k2, (ff, hidden), jnp.bfloat16),
            "b2": jnp.zeros((hidden,), jnp.float32),
            "ffn_ln_g": jnp.ones((hidden,), jnp.float32),
            "ffn_ln_b": jnp.zeros((hidden,), jnp.float32),
        }
        p["layers"].append(layer)
    return p


# ----------------------------------------------------------------------------
# Forward pass (glue in JAX, compute in Pallas)
# ----------------------------------------------------------------------------
def language_model_forward(params, x_ids, n_heads, mask=None, y=None):
    B, S = x_ids.shape
    H = params["tok_emb"].shape[1]

    # --- BERT embeddings (gathers are JAX glue; LN in Pallas) ---
    emb = (params["tok_emb"][x_ids]
           + params["pos_emb"][:S][None, :, :]
           + params["typ_emb"][0][None, None, :])
    h = pallas_layernorm(emb.reshape(B * S, H),
                         params["emb_ln_g"], params["emb_ln_b"])   # bf16

    if mask is None:
        mask = jnp.ones((B, S), jnp.float32)
    # keep the additive mask in f32 (never downcast -1e9 to bf16)
    attn_bias = ((1.0 - mask.astype(jnp.float32)) * -1e9)[:, None, :]  # [B,1,S]

    # --- transformer layers (no materialized transposes between kernels) ---
    for lyr in params["layers"]:
        flat = h                                            # [B*S, H] bf16
        qkv = pallas_dense(flat, lyr["w_qkv"], lyr["b_qkv"])       # [B*S, 3H]
        ctx = pallas_flash_attention(qkv.reshape(B, S, 3 * H),
                                     attn_bias, n_heads)           # [B, S, H]
        ctx = ctx.reshape(B * S, H)                                 # free reshape

        # wo matmul with residual-add + LayerNorm fused into the epilogue
        h = pallas_dense_add_ln(ctx, lyr["wo"], lyr["bo"], flat,
                                lyr["attn_ln_g"], lyr["attn_ln_b"])

        ffn = pallas_dense(h, lyr["w1"], lyr["b1"], activation="gelu")
        # w2 matmul with residual-add + LayerNorm fused into the epilogue
        h = pallas_dense_add_ln(ffn, lyr["w2"], lyr["b2"], h,
                                lyr["ffn_ln_g"], lyr["ffn_ln_b"])

    # --- classifier head fused with softmax / cross-entropy ---
    # (Dropout(0.1) is identity in eval; the pooling layer is constructed but
    #  never applied in the reference forward(), so it is skipped.)
    if y is not None:
        return pallas_classifier_xent(h, params["cls_w"], params["cls_b"],
                                      y.reshape(-1))
    probs = pallas_classifier_softmax(h, params["cls_w"], params["cls_b"])
    return probs.reshape(B, S, params["cls_w"].shape[1])


# ----------------------------------------------------------------------------
# Demo
# ----------------------------------------------------------------------------
if __name__ == "__main__":
    B, S, H, NH, FF, VOCAB, LAYERS = 2, 8, 32, 4, 64, 30, 2

    key = jax.random.PRNGKey(0)
    k_params, k_x, k_y = jax.random.split(key, 3)

    params = init_params(k_params, VOCAB, H, LAYERS, NH, FF, max_pos=64)

    x_ids = jax.random.randint(k_x, (B, S), 0, VOCAB, dtype=jnp.int32)
    mask = jnp.concatenate(
        [jnp.ones((B, S - 2), jnp.float32), jnp.zeros((B, 2), jnp.float32)],
        axis=1)
    y = jax.random.randint(k_y, (B, S), 0, VOCAB, dtype=jnp.int32)
    y = y.at[:, -2:].set(-1)          # ignore_index positions

    probs = language_model_forward(params, x_ids, NH, mask=mask)      # softmax
    loss = language_model_forward(params, x_ids, NH, mask=mask, y=y)  # CE loss
    jax.block_until_ready(probs)
    jax.block_until_ready(loss)

    assert probs.shape == (B, S, VOCAB)
    assert bool(jnp.all(jnp.isfinite(probs.astype(jnp.float32))))
    assert bool(jnp.isfinite(loss))
    assert bool(jnp.allclose(jnp.sum(probs.astype(jnp.float32), axis=-1),
                             1.0, atol=1e-2))

    print("KERNEL_OK")
</pallas_src>

<mosaic_0001>
module attributes {stable_mosaic.version = 11 : i64} {
  func.func @_ln_kernel(%arg0: i32, %arg1: memref<16x32xf32, #tpu.memory_space<vmem>>, %arg2: memref<1x32xf32, #tpu.memory_space<vmem>>, %arg3: memref<1x32xf32, #tpu.memory_space<vmem>>, %arg4: memref<16x32xbf16, #tpu.memory_space<vmem>>) attributes {dimension_semantics = [#tpu.dimension_semantics<parallel>], iteration_bounds = array<i64: 1>, scalar_prefetch = 0 : i64, scratch_operands = 0 : i64, tpu.core_type = #tpu.core_type<tc>, window_params = [{transform_indices = @transform_0, window_bounds = array<i64: 16, 32>}, {pipeline_mode = #tpu.pipeline_mode<synchronous>, transform_indices = @transform_1, window_bounds = array<i64: 1, 32>}, {pipeline_mode = #tpu.pipeline_mode<synchronous>, transform_indices = @transform_2, window_bounds = array<i64: 1, 32>}, {transform_indices = @transform_3, window_bounds = array<i64: 16, 32>}]} {
    %c0 = arith.constant 0 : index
    %c0_0 = arith.constant 0 : index
    %0 = vector.load %arg1[%c0, %c0_0] : memref<16x32xf32, #tpu.memory_space<vmem>>, vector<16x32xf32>
    %cst = arith.constant dense<0.000000e+00> : vector<16xf32>
    %1 = vector.multi_reduction <add>, %0, %cst [1] : vector<16x32xf32> to vector<16xf32>
    %2 = vector.shape_cast %1 : vector<16xf32> to vector<16x1xf32>
    %cst_1 = arith.constant 3.200000e+01 : f32
    %3 = vector.broadcast %cst_1 : f32 to vector<16x1xf32>
    %4 = arith.divf %2, %3 : vector<16x1xf32>
    %5 = vector.broadcast %4 : vector<16x1xf32> to vector<16x32xf32>
    %6 = arith.subf %0, %5 : vector<16x32xf32>
    %7 = arith.mulf %6, %6 : vector<16x32xf32>
    %cst_2 = arith.constant dense<0.000000e+00> : vector<16xf32>
    %8 = vector.multi_reduction <add>, %7, %cst_2 [1] : vector<16x32xf32> to vector<16xf32>
    %9 = vector.shape_cast %8 : vector<16xf32> to vector<16x1xf32>
    %cst_3 = arith.constant 3.200000e+01 : f32
    %10 = vector.broadcast %cst_3 : f32 to vector<16x1xf32>
    %11 = arith.divf %9, %10 : vector<16x1xf32>
    %12 = vector.broadcast %4 : vector<16x1xf32> to vector<16x32xf32>
    %13 = arith.subf %0, %12 : vector<16x32xf32>
    %cst_4 = arith.constant 9.99999996E-13 : f32
    %14 = vector.broadcast %cst_4 : f32 to vector<16x1xf32>
    %15 = arith.addf %11, %14 : vector<16x1xf32>
    %16 = math.rsqrt %15 : vector<16x1xf32>
    %17 = vector.broadcast %16 : vector<16x1xf32> to vector<16x32xf32>
    %18 = arith.mulf %13, %17 : vector<16x32xf32>
    %c0_5 = arith.constant 0 : index
    %c0_6 = arith.constant 0 : index
    %19 = vector.load %arg2[%c0_5, %c0_6] : memref<1x32xf32, #tpu.memory_space<vmem>>, vector<1x32xf32>
    %20 = vector.broadcast %19 : vector<1x32xf32> to vector<16x32xf32>
    %21 = arith.mulf %18, %20 : vector<16x32xf32>
    %c0_7 = arith.constant 0 : index
    %c0_8 = arith.constant 0 : index
    %22 = vector.load %arg3[%c0_7, %c0_8] : memref<1x32xf32, #tpu.memory_space<vmem>>, vector<1x32xf32>
    %23 = vector.broadcast %22 : vector<1x32xf32> to vector<16x32xf32>
    %24 = arith.addf %21, %23 : vector<16x32xf32>
    %25 = arith.truncf %24 : vector<16x32xf32> to vector<16x32xbf16>
    %c0_9 = arith.constant 0 : index
    %c0_10 = arith.constant 0 : index
    %26 = vector.load %arg4[%c0_9, %c0_10] : memref<16x32xbf16, #tpu.memory_space<vmem>>, vector<16x32xbf16>
    tpu.vector_store %arg4[%c0_9, %c0_10], %25 {strides = array<i32>} : memref<16x32xbf16, #tpu.memory_space<vmem>>, vector<16x32xbf16>,
    return
  }
  func.func @transform_0(%arg0: i32) -> (i32, i32) {
    %c0_i32 = arith.constant 0 : i32
    %c0_i32_0 = arith.constant 0 : i32
    return %arg0, %c0_i32 : i32, i32
  }
  func.func @transform_1(%arg0: i32) -> (i32, i32) {
    %c0_i32 = arith.constant 0 : i32
    %c0_i32_0 = arith.constant 0 : i32
    %c0_i32_1 = arith.constant 0 : i32
    return %c0_i32, %c0_i32_0 : i32, i32
  }
  func.func @transform_2(%arg0: i32) -> (i32, i32) {
    %c0_i32 = arith.constant 0 : i32
    %c0_i32_0 = arith.constant 0 : i32
    %c0_i32_1 = arith.constant 0 : i32
    return %c0_i32, %c0_i32_0 : i32, i32
  }
  func.func @transform_3(%arg0: i32) -> (i32, i32) {
    %c0_i32 = arith.constant 0 : i32
    %c0_i32_0 = arith.constant 0 : i32
    return %arg0, %c0_i32 : i32, i32
  }
}

</mosaic_0001>

<bundles_post_ra>
// kernel: tpu_custom_call.1
= control target key start
LH: loop header
LB: loop body
LE: loop exit
PB: predicated region body
PF: predicated region fallthrough
CT: control target
= control target key end

     0   :  { %8 = vsyncpa [#allocation3], 0  ;;  %s229_s0 = inlined_call_operand.hbm [shape: f32[16,32], index: 0, kind: input, shape index: {}]   ;;  %s230_s1 = inlined_call_operand.vmem [shape: f32[1,32], index: 1, kind: input, shape index: {}]   ;;  %s231_s2 = inlined_call_operand.vmem [shape: f32[1,32], index: 2, kind: input, shape index: {}]   ;;  %s232_s3 = inlined_call_operand.hbm [shape: bf16[16,32], index: 3, kind: output, shape index: {}]  }
   0x1   :  { %9 = vsyncpa [#allocation4], 0  ;;  %s169_s12 = smov [#allocation2]   ;;  %s121_s16 = scalar_lea.hbm %s229_s0, 256 }
   0x2   :  { %s15_s13 = sshll.u32 %s169_s12, 4  ;;  %p122_p0 = scmp.ne.s32.totalorder %s229_s0, %s121_s16  ;;  %s16_s13 = int_to_ptr.vmem [resolvable:$true] %s15_s13 }
   0x3   :  { %p125_p1 = scmp.lt.u32.totalorder %s121_s16, %s229_s0 }
   0x5   :  { %p127_p2 = pnand %p125_p1, %p122_p0 }
   0x7   :  { %130 = shalt.err (!%p127_p2)
}
   0x8   :  { %s131_s21 = scalar_lea.vmem %s16_s13, 256  ;;  %p136_p4 = scmp.lt.s32.totalorder %s16_s13, %s16_s13 }
   0x9   :  { %p132_p3 = scmp.ne.s32.totalorder %s16_s13, %s131_s21  ;;  %p137_p5 = scmp.lt.s32.totalorder %s131_s21, %s131_s21 }
   0xb   :  { %p138_p6 = por %p137_p5, %p136_p4 }
   0xd   :  { %p139_p7 = pnand %p138_p6, %p132_p3 }
   0xf   :  { %142 = shalt.err (!%p139_p7)
}
  0x10   :  { %s170_s22 = smov 128   ;;  %s171_s23 = smov 8  }
  0x11   :  { %21 = dma.hbm_to_vmem [thread:$0]  %s229_s0, 256, %s16_s13, [#allocation3], %s170_s22, %s170_s22, %s171_s23  }
  0x12   :  { %165 = dma.done.wait [#allocation3], 256  }
  0x13   :  { %166 = vsyncadd [#allocation3], 4294967040  ;;  %vm31_vm0 = vcmask 261120   ;;  %v29_v0 = vld [vmem:[#allocation2] sm:$0xff]  ;;  %v30_v1 = vld [vmem:[#allocation2 + $0x8] sm:$0xff]  ;;  %vm85_vm1 = vcmask 257024  }
  0x14   :  { %v32_v2 = vsel %vm31_vm0, %v29_v0, 0.0  ;;  %v35_v3 = vsel %vm31_vm0, %v30_v1, 0.0  ;;  %v105_v21 = vld [vmem:[%s230_s1] ss:$0 sm:$0xff]  ;;  %s172_s29 = smov [#allocation5]  }
  0x15   :  { %33 = vadd.xlane.f32.xlu0 %v32_v2  ;;  %v106_v23 = vld [vmem:[%s231_s2] ss:$0 sm:$0xff]  ;;  %s93_s30 = sshll.u32 %s172_s29, 4  ;;  %s94_s30 = int_to_ptr.vmem [resolvable:$true] %s93_s30 }
  0x16   :  { %s143_s1 = scalar_lea.vmem %s94_s30, 128  ;;  %p148_p9 = scmp.lt.s32.totalorder %s94_s30, %s94_s30 }
  0x17   :  { %p144_p8 = scmp.ne.s32.totalorder %s94_s30, %s143_s1  ;;  %p149_p10 = scmp.lt.s32.totalorder %s143_s1, %s143_s1 }
  0x19   :  { %36 = vadd.xlane.f32.xlu0 %v35_v3  ;;  %p150_p11 = por %p149_p10, %p148_p9 }
  0x1b   :  { %p151_p12 = pnand %p150_p11, %p144_p8 }
  0xa2   :  { %v34_v4 = vpop.xlane.xlu0 %33 }
  0xa3   :  { %v39_v5 = vmul.f32 0.03125, %v34_v4 }
  0xa5   :  { %v41_v6 = vsub.f32 %v29_v0, %v39_v5 }
  0xa6   :  { %v37_v7 = vpop.xlane.xlu0 %36 }
  0xa7   :  { %v40_v8 = vmul.f32 0.03125, %v37_v7  ;;  %v43_v9 = vmul.f32 %v41_v6, %v41_v6 }
  0xa9   :  { %v42_v10 = vsub.f32 %v30_v1, %v40_v8  ;;  %v45_v11 = vsel %vm31_vm0, %v43_v9, 0.0 }
  0xaa   :  { %46 = vadd.xlane.f32.xlu1 %v45_v11 }
  0xab   :  { %v44_v12 = vmul.f32 %v42_v10, %v42_v10 }
  0xad   :  { %v48_v13 = vsel %vm31_vm0, %v44_v12, 0.0 }
  0xae   :  { %49 = vadd.xlane.f32.xlu1 %v48_v13 }
 0x137   :  { %v47_v14 = vpop.xlane.xlu1 %46 }
 0x138   :  { %v51_v15 = vmul.f32 0.03125, %v47_v14 }
 0x13a   :  { %v53_v16 = vadd.f32 1e-12, %v51_v15 }
 0x13b   :  { %v50_v17 = vpop.xlane.xlu1 %49 }
 0x13c   :  { %117 = vrsqrt.f32 %v53_v16  ;;  %v52_v18 = vmul.f32 0.03125, %v50_v17 }
 0x13e   :  { %v54_v19 = vadd.f32 1e-12, %v52_v18 }
 0x140   :  { %119 = vrsqrt.f32 %v54_v19 }
 0x146   :  { %v118_v20 = vpop.eup %117 }
 0x147   :  { %v57_v22 = vmul.f32 %v118_v20, %v41_v6 }
 0x149   :  { %v66_v24 = vmul.f32 %v105_v21, %v57_v22 }
 0x14a   :  { %v120_v25 = vpop.eup %119 }
 0x14b   :  { %v58_v26 = vmul.f32 %v120_v25, %v42_v10  ;;  %v75_v27 = vadd.f32 %v106_v23, %v66_v24 }
 0x14d   :  { %v67_v28 = vmul.f32 %v105_v21, %v58_v26  ;;  %v109_v29 = vpack.c.bf16 %v75_v27, %v75_v27 }
 0x14f   :  { %v76_v30 = vadd.f32 %v106_v23, %v67_v28  ;;  %86 = vst.msk [vmem:[#allocation5] sm:$0xf] %vm85_vm1, %v109_v29 }
 0x151   :  { %v110_v31 = vpack.c.bf16 %v76_v30, %v76_v30 }
 0x153   :  { %87 = vst.msk [vmem:[#allocation5 + $0x4] sm:$0xf] %vm85_vm1, %v110_v31 }
 0x154   :  { %154 = shalt.err (!%p151_p12)
}
 0x155   :  { %s155_s5 = scalar_lea.hbm %s232_s3, 128 }
 0x156   :  { %p156_p13 = scmp.ne.s32.totalorder %s232_s3, %s155_s5  ;;  %p159_p0 = scmp.lt.u32.totalorder %s155_s5, %s232_s3 }
 0x158   :  { %p161_p1 = pnand %p159_p0, %p156_p13 }
 0x15a   :  { %164 = shalt.err (!%p161_p1)
}
 0x15b   :  { %s173_s10 = smov 64   ;;  %s174_s11 = smov 4  }
 0x15c   :  { %99 = dma.vmem_to_hbm [thread:$0]  %s94_s30, 128, %s232_s3, [#allocation4], %s173_s10, %s173_s10, %s174_s11  }
 0x15d   :  { %167 = dma.done.wait [#allocation4], 128  }
 0x15e   :  { %168 = vsyncadd [#allocation4], 4294967168 }
 0x15f   :  { %103 = vsyncpa [#allocation3], 1 }
 0x160   :  { %104 = vsyncpa [#allocation4], 1 }

</bundles_post_ra>
